<compile_context>
chip_gen: v7x
topology: tpu7x:2x2x1
jax: 0.10.0
libtpu: 0.0.40
codegen_flags: <defaults>
</compile_context>

<pallas_src>
import jax
import jax.numpy as jnp
from jax.experimental import pallas as pl
from jax.experimental.pallas import tpu as pltpu


_LANES = 128
_SUBLANE = 32          # 32-row alignment keeps f32/bf16/int8/fp8 rows unmasked
_MAX_TILE_ROWS = 8192  # 8192 rows * 128 lanes * 4 B = 4 MiB per f32 block


def _round_up(n, m):
    return ((n + m - 1) // m) * m


# ---------------------------------------------------------------------------
# Path 1: direct HBM -> HBM DMA (no VMEM staging, works for any shape/dtype).
# ---------------------------------------------------------------------------
def _dma_copy_kernel(x_ref, o_ref, sem):
    cp = pltpu.make_async_copy(x_ref, o_ref, sem)
    cp.start()
    cp.wait()


def _pallas_hbm_dma_copy(x):
    """Materialize a copy of `x` via one HBM->HBM DMA descriptor."""
    return pl.pallas_call(
        _dma_copy_kernel,
        out_shape=jax.ShapeDtypeStruct(x.shape, x.dtype),
        in_specs=[pl.BlockSpec(memory_space=pl.ANY)],
        out_specs=pl.BlockSpec(memory_space=pl.ANY),
        scratch_shapes=[pltpu.SemaphoreType.DMA],
        compiler_params=pltpu.CompilerParams(has_side_effects=True),
    )(x)


# ---------------------------------------------------------------------------
# Path 2: BlockSpec-pipelined VMEM copy (benchmark / pipelining reference).
# ---------------------------------------------------------------------------
def _copy_kernel(x_ref, o_ref):
    # Identity copy of one (tile_rows, 128) tile — the contiguous memory pass.
    o_ref[...] = x_ref[...]


def _pallas_tiled_copy(flat):
    """Bandwidth-bound tiled copy of a flat buffer whose size % 128 == 0."""
    rows = flat.size // _LANES
    x2d = flat.reshape(rows, _LANES)

    if rows <= _SUBLANE:
        # Tiny input: one full-extent block (block dim == array dim is allowed
        # even when not 8-aligned); grid = 1.
        tile_rows = rows
    else:
        # Split into >= 2 grid steps so dimension_semantics=("parallel",) can
        # shard the copy across v7x's two TensorCores; cap at 4 MiB f32 blocks.
        tile_rows = min(_MAX_TILE_ROWS, _round_up(pl.cdiv(rows, 2), _SUBLANE))
    grid = (pl.cdiv(rows, tile_rows),)

    # Honest VMEM request: in + out blocks, double-buffered, plus slack.
    block_bytes = tile_rows * _LANES * jnp.dtype(flat.dtype).itemsize
    vmem_limit = min(32 << 20, max(4 << 20, 4 * block_bytes + (2 << 20)))

    # TODO(synk): optionally pipeline_mode=pl.Buffered(3) on the input spec if a
    # v7x sweep shows exposed DMA at this block size (few-percent win at most).
    out2d = pl.pallas_call(
        _copy_kernel,
        out_shape=jax.ShapeDtypeStruct((rows, _LANES), flat.dtype),
        grid=grid,
        in_specs=[pl.BlockSpec((tile_rows, _LANES), lambda i: (i, 0))],
        out_specs=pl.BlockSpec((tile_rows, _LANES), lambda i: (i, 0)),
        compiler_params=pltpu.CompilerParams(
            dimension_semantics=("parallel",),
            vmem_limit_bytes=vmem_limit,
        ),
    )(x2d)
    return out2d.reshape(-1)


# ---------------------------------------------------------------------------
# Public wrapper: equivalent of ReshapeLayer(shape).forward(x).
# ---------------------------------------------------------------------------
def reshape_layer(x, shape, *, use_pallas=False, method="dma"):
    """Row-major reshape, identical to torch `.contiguous().view(*shape)`.

    Default: metadata-only reshape (zero copies).  `use_pallas=True` explicitly
    materializes the reshaped tensor via a Pallas copy:
      method="dma"   -> single HBM->HBM DMA (any shape/dtype).
      method="tiled" -> BlockSpec-pipelined VMEM copy (size%128==0 required;
                        other sizes route to the DMA path).
    """
    if not use_pallas:
        return x.reshape(shape)

    if method == "dma":
        return _pallas_hbm_dma_copy(x).reshape(shape)

    flat = x.reshape(-1)
    if flat.size % _LANES != 0:
        # Non-lane-aligned sizes: the DMA path has no %128 restriction.
        return _pallas_hbm_dma_copy(x).reshape(shape)
    return _pallas_tiled_copy(flat).reshape(shape)


if __name__ == "__main__":
    key = jax.random.PRNGKey(0)

    # (input shape, target shape, dtype)
    cases = [
        ((2, 4, 16, 16), (2, 4 * 16 * 16), jnp.float32),    # NCHW -> flat features
        ((8, 32, 32, 32), (8, 32 * 32 * 32), jnp.float32),  # 2048 rows -> 2-step grid
        ((5, 13, 128), (13, 5 * 128), jnp.float32),         # 65 rows -> masked last block
        ((3, 5, 7), (105,), jnp.float32),                   # size % 128 != 0 -> DMA only
        ((2, 64), (128,), jnp.float32),                     # tiny: 1 row
        ((4, 8, 128), (32, 128), jnp.bfloat16),             # bf16, 32-row-aligned block
    ]

    for in_shape, out_shape, dtype in cases:
        key, sub = jax.random.split(key)
        x = jax.random.normal(sub, in_shape, dtype=jnp.float32).astype(dtype)

        # Reference: plain row-major reshape (== torch .contiguous().view()).
        y_ref = x.reshape(out_shape)

        y_fast = jax.block_until_ready(reshape_layer(x, out_shape))
        y_dma = jax.block_until_ready(
            reshape_layer(x, out_shape, use_pallas=True, method="dma"))
        y_tiled = jax.block_until_ready(
            reshape_layer(x, out_shape, use_pallas=True, method="tiled"))

        for y in (y_fast, y_dma, y_tiled):
            assert y.shape == tuple(out_shape), (y.shape, out_shape)
            assert y.dtype == x.dtype, (y.dtype, x.dtype)
            assert bool(jnp.array_equal(y, y_ref)), (
                f"reshape output mismatch for {in_shape} -> {out_shape}")

    print("KERNEL_OK")
</pallas_src>

<mosaic_0001>
module attributes {stable_mosaic.version = 11 : i64} {
  func.func @_dma_copy_kernel(%arg0: memref<2x4x16x16xf32, #tpu.memory_space<any>>, %arg1: memref<2x4x16x16xf32, #tpu.memory_space<any>>, %arg2: memref<!tpu.dma_semaphore, #tpu.memory_space<semaphore_mem>>) attributes {dimension_semantics = [], scalar_prefetch = 0 : i64, scratch_operands = 1 : i64, tpu.core_type = #tpu.core_type<tc>} {
    tpu.enqueue_dma source(%arg0 : memref<2x4x16x16xf32, #tpu.memory_space<any>>) target(%arg1 : memref<2x4x16x16xf32, #tpu.memory_space<any>>) target_semaphore(%arg2 : memref<!tpu.dma_semaphore, #tpu.memory_space<semaphore_mem>>)
    tpu.wait_dma2 semaphore(%arg2 : memref<!tpu.dma_semaphore, #tpu.memory_space<semaphore_mem>>) src(%arg0 : memref<2x4x16x16xf32, #tpu.memory_space<any>>) dst(%arg1 : memref<2x4x16x16xf32, #tpu.memory_space<any>>)
    return
  }
}

</mosaic_0001>

<bundles_post_ra>
// kernel: tpu_custom_call.1
= control target key start
LH: loop header
LB: loop body
LE: loop exit
PB: predicated region body
PF: predicated region fallthrough
CT: control target
= control target key end

     0   :  { %s36_s6 = smov [#allocation2]   ;;  %s37_s7 = smov [#allocation3]   ;;  %s55_s0 = inlined_call_operand.hbm [shape: f32[2,4,16,16], index: 0, kind: input, shape index: {}]   ;;  %s56_s1 = inlined_call_operand.hbm [shape: f32[2,4,16,16], index: 1, kind: output, shape index: {}]  }
   0x1   :  { %s38_s8 = smov 0  }
   0x2   :  { %18 = dma.general %s55_s0, 2048, %s56_s1, %s36_s6, %s37_s7, [#allocation4], %s38_s8, 0  }
   0x3   :  { %34 = dma.done.wait [#allocation2], 2048 }
   0x4   :  { %35 = vsyncadd [#allocation2], 4294965248 }
   0x5   :  { %24 = vsyncmov [#allocation2] }
   0x8   :  { %s25_s13 = vpop.sfrf %24 }
   0x9   :  { %p30_p0 = scmp.ne.s32.totalorder %s25_s13, 0 }
   0xb   :  { %29 = shalt.err (%p30_p0)  }

</bundles_post_ra>
